<compile_context>
chip_gen: v6e
topology: v6e:2x2x1
jax: 0.10.0
libtpu: 0.0.40
codegen_flags: <defaults>
</compile_context>

<pallas_src>
import functools

import jax
import jax.numpy as jnp
from jax import lax
from jax.experimental import pallas as pl
from jax.experimental.pallas import tpu as pltpu

LANES = 128


def _round_up(x, m):
    return ((x + m - 1) // m) * m


def _pick_pair_block(B, n_c, n_r, row_cap=64):
    """Pick TB = pairs per grid step.

    Constraints: TB divides B; block row counts satisfy the (8, .) rule (or are full-array);
    TB*max(n_c,n_r) <= row_cap so the resident qkv/acc tiles stay in vregs; prefer >= 2 grid
    steps so v7x's two TensorCores both get work.
    """
    def ok_shape(tb):
        return tb == B or ((tb * n_c) % 8 == 0 and (tb * n_r) % 8 == 0)

    legal = [d for d in range(1, B + 1) if B % d == 0 and ok_shape(d)]
    if not legal:            # cannot happen: tb == B is always legal
        return B
    capped = [d for d in legal if d * max(n_c, n_r) <= row_cap]
    if not capped:
        return min(legal)
    multi = [d for d in capped if B // d >= 2]
    return max(multi) if multi else max(capped)


def _mha_kernel(ctx_ref, rel_ref, w_qkv_ref, b_qkv_ref, w_out_ref, b_out_ref, out_ref,
                *, head_num, dim, tb, n_c, n_r):
    """tb (context, related) pairs per grid step; rows of all pairs are stacked."""
    w_qkv = w_qkv_ref[...]                     # bf16 (dim, qkv_pad) = [WqT*scale | WkT | WvT | 0]
    b_qkv = b_qkv_ref[...]                     # f32  (1, qkv_pad)
    w_out = w_out_ref[...]                     # bf16 (dim, out_pad) = [WoT | 0]
    b_out = b_out_ref[...]                     # f32  (1, out_pad)

    ctx = ctx_ref[...].astype(jnp.bfloat16)    # (tb*n_c, dim)
    rel = rel_ref[...].astype(jnp.bfloat16)    # (tb*n_r, dim)

    # Fused Q|K|V projection: one lane-dense bf16 MXU matmul per operand, f32 accumulate.
    qkv_c = jnp.dot(ctx, w_qkv, preferred_element_type=jnp.float32) + b_qkv   # (tb*n_c, qkv_pad)
    qkv_r = jnp.dot(rel, w_qkv, preferred_element_type=jnp.float32) + b_qkv   # (tb*n_r, qkv_pad)

    rows_c = tb * n_c
    rows_r = tb * n_r
    hd = dim // head_num
    out_pad = w_out.shape[1]

    # Static block-diagonal "same pair" mask so score/PV matmuls run over the full row extent
    # of all tb pairs at once (scores for (query of pair p, key of pair q!=p) are masked out).
    if tb > 1:
        ri = lax.broadcasted_iota(jnp.int32, (rows_c, rows_r), 0)
        ci = lax.broadcasted_iota(jnp.int32, (rows_c, rows_r), 1)
        conds = []
        for p in range(tb):                    # tb is static -> a handful of VPU compares
            in_rows = (ri >= p * n_c) & (ri < (p + 1) * n_c)
            in_cols = (ci >= p * n_r) & (ci < (p + 1) * n_r)
            conds.append(in_rows & in_cols)
        same_pair = functools.reduce(jnp.logical_or, conds)
    else:
        same_pair = None

    # Accumulate the output projection head-by-head; no lane-concat of head outputs.
    acc = jnp.broadcast_to(b_out, (rows_c, out_pad))
    for h in range(head_num):                  # static head_num -> unrolled
        lo = h * hd
        q_h = qkv_c[:, lo:lo + hd]                         # (rows_c, hd) f32, scale pre-folded
        k_h = qkv_r[:, dim + lo:dim + lo + hd]             # (rows_r, hd) f32
        v_h = qkv_r[:, 2 * dim + lo:2 * dim + lo + hd]     # (rows_r, hd) f32

        # q_h @ k_h^T without materializing a transposed tile (contract last dims).
        # Scores / softmax / PV stay f32: activation-only data (no DMA to save), tiny tiles.
        s = lax.dot_general(q_h, k_h, (((1,), (1,)), ((), ())),
                            preferred_element_type=jnp.float32)               # (rows_c, rows_r)
        if same_pair is not None:
            s = jnp.where(same_pair, s, jnp.float32(-1e30))
        s = s - jnp.max(s, axis=-1, keepdims=True)
        p = jnp.exp(s)
        p = p * pl.reciprocal(jnp.sum(p, axis=-1, keepdims=True), approx=True)  # EUP slot

        head_out = jnp.dot(p, v_h, preferred_element_type=jnp.float32)        # (rows_c, hd)
        # Sublane row-slice of Wo: cheap, no lane relayout; bf16 MXU, f32 accumulate.
        acc = acc + jnp.dot(head_out.astype(jnp.bfloat16), w_out[lo:lo + hd, :],
                            preferred_element_type=jnp.float32)               # (rows_c, out_pad)

    out_ref[...] = acc.astype(out_ref.dtype)   # lane-dense (out_pad-wide) store


def prepare_mha_params(params, head_num):
    """One-time preprocessing (hoisted out of the per-call path).

    params follow torch.nn.MultiheadAttention layout:
      in_proj_weight (3*dim, dim), in_proj_bias (3*dim,),
      out_proj_weight (dim, dim),  out_proj_bias (dim,).
    Folds the 1/sqrt(head_dim) softmax scale into the Q rows, transposes, fuses Q|K|V,
    lane-pads to 128 multiples and casts weights to bf16 (biases stay f32).
    """
    dim = params["out_proj_weight"].shape[0]
    assert dim % head_num == 0, "dim must be divisible by head_num"
    hd = dim // head_num
    scale = 1.0 / (hd ** 0.5)

    w_in = params["in_proj_weight"].astype(jnp.float32)      # (3*dim, dim)
    b_in = params["in_proj_bias"].astype(jnp.float32)        # (3*dim,)
    w_o = params["out_proj_weight"].astype(jnp.float32)      # (dim, dim)
    b_o = params["out_proj_bias"].astype(jnp.float32)        # (dim,)

    # Fold the softmax scale into the Q portion (rows 0:dim) of the in-projection.
    scale_vec = jnp.concatenate([jnp.full((dim,), scale, jnp.float32),
                                 jnp.ones((2 * dim,), jnp.float32)])
    w_in = w_in * scale_vec[:, None]
    b_in = b_in * scale_vec

    qkv_pad = _round_up(3 * dim, LANES)
    out_pad = _round_up(dim, LANES)

    # x @ W_pt.T == x @ W_pt_transposed; W.T column blocks are [WqT | WkT | WvT].
    w_qkv = jnp.pad(w_in.T, ((0, 0), (0, qkv_pad - 3 * dim)))
    b_qkv = jnp.pad(b_in.reshape(1, 3 * dim), ((0, 0), (0, qkv_pad - 3 * dim)))
    w_out = jnp.pad(w_o.T, ((0, 0), (0, out_pad - dim)))
    b_out = jnp.pad(b_o.reshape(1, dim), ((0, 0), (0, out_pad - dim)))

    return {
        "w_qkv": w_qkv.astype(jnp.bfloat16),   # weights bf16: half the DMA / VMEM, 2x MXU rate
        "b_qkv": b_qkv,                        # biases f32 (added after f32-accum matmul)
        "w_out": w_out.astype(jnp.bfloat16),
        "b_out": b_out,
    }


@functools.partial(jax.jit, static_argnames=("head_num",))
def mh_item_attention_batched(related_entity, context_entity, prepared, *, head_num):
    """related_entity: (B, n_r, dim), context_entity: (B, n_c, dim) -> (B, n_c, dim)."""
    B, n_c, dim = context_entity.shape
    Br, n_r, dim_r = related_entity.shape
    assert Br == B and dim_r == dim
    assert dim % head_num == 0, "dim must be divisible by head_num"

    w_qkv, b_qkv = prepared["w_qkv"], prepared["b_qkv"]
    w_out, b_out = prepared["w_out"], prepared["b_out"]
    qkv_pad, out_pad = w_qkv.shape[1], w_out.shape[1]

    tb = _pick_pair_block(B, n_c, n_r)
    steps = B // tb
    rows_c, rows_r = tb * n_c, tb * n_r
    # TODO(synk): batched path (B > 1) assumes the chosen pair-block row counts are multiples
    # of 8 (true for tb == B or n_c, n_r multiples of 8); the single-pair path is unrestricted.
    assert tb == B or (rows_c % 8 == 0 and rows_r % 8 == 0), \
        "batched blocking needs n_c and n_r to be multiples of 8 (or a full-batch block)"

    # Row-stack the independent pairs: reshape is a free leading-dim collapse in XLA.
    ctx2 = context_entity.reshape(B * n_c, dim)
    rel2 = related_entity.reshape(B * n_r, dim)

    hd = dim // head_num
    flops = (2 * B * (n_c + n_r) * dim * qkv_pad
             + steps * head_num * (4 * rows_c * rows_r * hd + 2 * rows_c * hd * out_pad))
    transcendentals = steps * head_num * rows_c * rows_r            # exp in the softmax
    bytes_accessed = ((B * n_c * dim + B * n_r * dim + B * n_c * out_pad) * 4
                      + (w_qkv.size + w_out.size) * 2 + (b_qkv.size + b_out.size) * 4)

    out2 = pl.pallas_call(
        functools.partial(_mha_kernel, head_num=head_num, dim=dim, tb=tb, n_c=n_c, n_r=n_r),
        out_shape=jax.ShapeDtypeStruct((B * n_c, out_pad), context_entity.dtype),
        grid=(steps,),
        in_specs=[
            pl.BlockSpec((rows_c, dim), lambda g: (g, 0)),
            pl.BlockSpec((rows_r, dim), lambda g: (g, 0)),
            pl.BlockSpec((dim, qkv_pad), lambda g: (0, 0)),   # shared weights: DMA'd once
            pl.BlockSpec((1, qkv_pad), lambda g: (0, 0)),
            pl.BlockSpec((dim, out_pad), lambda g: (0, 0)),
            pl.BlockSpec((1, out_pad), lambda g: (0, 0)),
        ],
        out_specs=pl.BlockSpec((rows_c, out_pad), lambda g: (g, 0)),
        compiler_params=pltpu.CompilerParams(
            dimension_semantics=("parallel",),
            vmem_limit_bytes=32 * 1024 * 1024,   # explicit (v5e scoped default is only 16 MiB)
        ),
        cost_estimate=pl.CostEstimate(flops=flops, transcendentals=transcendentals,
                                      bytes_accessed=bytes_accessed),
    )(ctx2, rel2, w_qkv, b_qkv, w_out, b_out)

    # Lane-dense (out_pad-wide) store inside the kernel; trim padded columns once here.
    return out2[:, :dim].reshape(B, n_c, dim)


def mh_item_attention(related_entity, context_entity, prepared, head_num):
    """Module-equivalent forward: related (n_r, dim), context (n_c, dim) -> (n_c, dim)."""
    out = mh_item_attention_batched(related_entity[None], context_entity[None],
                                    prepared, head_num=head_num)
    return out[0]


def _reference(related_entity, context_entity, params, head_num):
    """Pure-JAX f32 reference mirroring torch.nn.MultiheadAttention forward."""
    dim = context_entity.shape[1]
    hd = dim // head_num
    wq = params["in_proj_weight"][0 * dim:1 * dim, :]
    wk = params["in_proj_weight"][1 * dim:2 * dim, :]
    wv = params["in_proj_weight"][2 * dim:3 * dim, :]
    bq = params["in_proj_bias"][0 * dim:1 * dim]
    bk = params["in_proj_bias"][1 * dim:2 * dim]
    bv = params["in_proj_bias"][2 * dim:3 * dim]
    q = context_entity @ wq.T + bq
    k = related_entity @ wk.T + bk
    v = related_entity @ wv.T + bv
    n_c, n_r = q.shape[0], k.shape[0]
    qh = q.reshape(n_c, head_num, hd).transpose(1, 0, 2)
    kh = k.reshape(n_r, head_num, hd).transpose(1, 0, 2)
    vh = v.reshape(n_r, head_num, hd).transpose(1, 0, 2)
    s = jnp.einsum("hqd,hkd->hqk", qh, kh) / jnp.sqrt(hd).astype(jnp.float32)
    p = jax.nn.softmax(s, axis=-1)
    o = jnp.einsum("hqk,hkd->hqd", p, vh).transpose(1, 0, 2).reshape(n_c, dim)
    return o @ params["out_proj_weight"].T + params["out_proj_bias"]


if __name__ == "__main__":
    dim = 32
    head_num = 4
    n_r = 16      # related entities (keys/values)
    n_c = 8       # context entities (queries)
    batch = 8     # batched variant: TB=4 pairs/step -> 2 grid steps (both v7x TCs busy)

    key = jax.random.PRNGKey(0)
    k1, k2, k3, k4, k5, k6, k7, k8 = jax.random.split(key, 8)

    xavier = (6.0 / (3 * dim + dim)) ** 0.5
    params = {
        "in_proj_weight": jax.random.uniform(k1, (3 * dim, dim), jnp.float32, -xavier, xavier),
        "in_proj_bias": jax.random.uniform(k2, (3 * dim,), jnp.float32, -0.1, 0.1),
        "out_proj_weight": jax.random.uniform(
            k3, (dim, dim), jnp.float32, -(1.0 / dim ** 0.5), 1.0 / dim ** 0.5),
        "out_proj_bias": jax.random.uniform(k4, (dim,), jnp.float32, -0.1, 0.1),
    }
    prepared = prepare_mha_params(params, head_num)   # one-time fuse/transpose/pad/bf16/scale-fold

    # bf16 MXU inputs + approx reciprocal -> loosened tolerance vs the f32 reference.
    ATOL = RTOL = 4e-2

    # --- single instance (matches the PyTorch module's forward) ---
    related_entity = jax.random.normal(k5, (n_r, dim), jnp.float32)
    context_entity = jax.random.normal(k6, (n_c, dim), jnp.float32)

    out = jax.block_until_ready(
        mh_item_attention(related_entity, context_entity, prepared, head_num))
    ref = _reference(related_entity, context_entity, params, head_num)
    assert out.shape == (n_c, dim)
    assert jnp.allclose(out, ref, atol=ATOL, rtol=RTOL), "single-instance mismatch vs reference"

    # --- batched (TB pairs per grid step, parallel batch axis) ---
    rel_b = jax.random.normal(k7, (batch, n_r, dim), jnp.float32)
    ctx_b = jax.random.normal(k8, (batch, n_c, dim), jnp.float32)
    out_b = jax.block_until_ready(
        mh_item_attention_batched(rel_b, ctx_b, prepared, head_num=head_num))
    ref_b = jnp.stack([_reference(rel_b[i], ctx_b[i], params, head_num) for i in range(batch)])
    assert out_b.shape == (batch, n_c, dim)
    assert jnp.allclose(out_b, ref_b, atol=ATOL, rtol=RTOL), "batched mismatch vs reference"

    print("KERNEL_OK")
</pallas_src>

<mosaic_0001>
module attributes {stable_mosaic.version = 11 : i64} {
  func.func @_mha_kernel(%arg0: i32, %arg1: memref<8x32xf32, #tpu.memory_space<vmem>>, %arg2: memref<16x32xf32, #tpu.memory_space<vmem>>, %arg3: memref<32x128xbf16, #tpu.memory_space<vmem>>, %arg4: memref<1x128xf32, #tpu.memory_space<vmem>>, %arg5: memref<32x128xbf16, #tpu.memory_space<vmem>>, %arg6: memref<1x128xf32, #tpu.memory_space<vmem>>, %arg7: memref<8x128xf32, #tpu.memory_space<vmem>>) attributes {dimension_semantics = [#tpu.dimension_semantics<parallel>], iteration_bounds = array<i64: 1>, scalar_prefetch = 0 : i64, scratch_operands = 0 : i64, tpu.core_type = #tpu.core_type<tc>, window_params = [{transform_indices = @transform_0, window_bounds = array<i64: 8, 32>}, {transform_indices = @transform_1, window_bounds = array<i64: 16, 32>}, {pipeline_mode = #tpu.pipeline_mode<synchronous>, transform_indices = @transform_2, window_bounds = array<i64: 32, 128>}, {pipeline_mode = #tpu.pipeline_mode<synchronous>, transform_indices = @transform_3, window_bounds = array<i64: 1, 128>}, {pipeline_mode = #tpu.pipeline_mode<synchronous>, transform_indices = @transform_4, window_bounds = array<i64: 32, 128>}, {pipeline_mode = #tpu.pipeline_mode<synchronous>, transform_indices = @transform_5, window_bounds = array<i64: 1, 128>}, {transform_indices = @transform_6, window_bounds = array<i64: 8, 128>}]} {
    %c0 = arith.constant 0 : index
    %c0_0 = arith.constant 0 : index
    %0 = vector.load %arg3[%c0, %c0_0] : memref<32x128xbf16, #tpu.memory_space<vmem>>, vector<32x128xbf16>
    %c0_1 = arith.constant 0 : index
    %c0_2 = arith.constant 0 : index
    %1 = vector.load %arg4[%c0_1, %c0_2] : memref<1x128xf32, #tpu.memory_space<vmem>>, vector<1x128xf32>
    %c0_3 = arith.constant 0 : index
    %c0_4 = arith.constant 0 : index
    %2 = vector.load %arg5[%c0_3, %c0_4] : memref<32x128xbf16, #tpu.memory_space<vmem>>, vector<32x128xbf16>
    %c0_5 = arith.constant 0 : index
    %c0_6 = arith.constant 0 : index
    %3 = vector.load %arg6[%c0_5, %c0_6] : memref<1x128xf32, #tpu.memory_space<vmem>>, vector<1x128xf32>
    %c0_7 = arith.constant 0 : index
    %c0_8 = arith.constant 0 : index
    %4 = vector.load %arg1[%c0_7, %c0_8] : memref<8x32xf32, #tpu.memory_space<vmem>>, vector<8x32xf32>
    %5 = arith.truncf %4 : vector<8x32xf32> to vector<8x32xbf16>
    %c0_9 = arith.constant 0 : index
    %c0_10 = arith.constant 0 : index
    %6 = vector.load %arg2[%c0_9, %c0_10] : memref<16x32xf32, #tpu.memory_space<vmem>>, vector<16x32xf32>
    %7 = arith.truncf %6 : vector<16x32xf32> to vector<16x32xbf16>
    %cst = arith.constant dense<0.000000e+00> : vector<8x128xf32>
    %8 = tpu.matmul %5, %0, %cst {dimension_numbers = #tpu.dot_dimension_numbers<[1], [0], [0], [1], [0, 0, 1, 1], [], []>} : vector<8x32xbf16>, vector<32x128xbf16>, vector<8x128xf32> -> vector<8x128xf32>
    %9 = vector.broadcast %1 : vector<1x128xf32> to vector<8x128xf32>
    %10 = arith.addf %8, %9 : vector<8x128xf32>
    %cst_11 = arith.constant dense<0.000000e+00> : vector<16x128xf32>
    %11 = tpu.matmul %7, %0, %cst_11 {dimension_numbers = #tpu.dot_dimension_numbers<[1], [0], [0], [1], [0, 0, 1, 1], [], []>} : vector<16x32xbf16>, vector<32x128xbf16>, vector<16x128xf32> -> vector<16x128xf32>
    %12 = vector.broadcast %1 : vector<1x128xf32> to vector<16x128xf32>
    %13 = arith.addf %11, %12 : vector<16x128xf32>
    %14 = vector.shape_cast %3 : vector<1x128xf32> to vector<1x128xf32>
    %15 = vector.broadcast %14 : vector<1x128xf32> to vector<8x128xf32>
    %16 = vector.extract_strided_slice %10 {offsets = [0, 0], sizes = [8, 8], strides = [1, 1]} : vector<8x128xf32> to vector<8x8xf32>
    %17 = vector.extract_strided_slice %13 {offsets = [0, 32], sizes = [16, 8], strides = [1, 1]} : vector<16x128xf32> to vector<16x8xf32>
    %18 = vector.extract_strided_slice %13 {offsets = [0, 64], sizes = [16, 8], strides = [1, 1]} : vector<16x128xf32> to vector<16x8xf32>
    %cst_12 = arith.constant dense<0.000000e+00> : vector<8x16xf32>
    %19 = tpu.matmul %16, %17, %cst_12 {dimension_numbers = #tpu.dot_dimension_numbers<[1], [1], [0], [0], [0, 0, 1, 0], [], []>} : vector<8x8xf32>, vector<16x8xf32>, vector<8x16xf32> -> vector<8x16xf32>
    %cst_13 = arith.constant dense<0xFF800000> : vector<8xf32>
    %20 = vector.multi_reduction <maximumf>, %19, %cst_13 [1] : vector<8x16xf32> to vector<8xf32>
    %21 = vector.shape_cast %20 : vector<8xf32> to vector<8x1xf32>
    %22 = vector.broadcast %21 : vector<8x1xf32> to vector<8x16xf32>
    %23 = arith.subf %19, %22 : vector<8x16xf32>
    %24 = math.exp %23 : vector<8x16xf32>
    %cst_14 = arith.constant dense<0.000000e+00> : vector<8xf32>
    %25 = vector.multi_reduction <add>, %24, %cst_14 [1] : vector<8x16xf32> to vector<8xf32>
    %26 = vector.shape_cast %25 : vector<8xf32> to vector<8x1xf32>
    %27 = tpu.reciprocal %26 {approx = true} : vector<8x1xf32> -> vector<8x1xf32>
    %28 = vector.broadcast %27 : vector<8x1xf32> to vector<8x16xf32>
    %29 = arith.mulf %24, %28 : vector<8x16xf32>
    %cst_15 = arith.constant dense<0.000000e+00> : vector<8x8xf32>
    %30 = tpu.matmul %29, %18, %cst_15 {dimension_numbers = #tpu.dot_dimension_numbers<[1], [0], [0], [1], [0, 0, 1, 1], [], []>} : vector<8x16xf32>, vector<16x8xf32>, vector<8x8xf32> -> vector<8x8xf32>
    %31 = arith.truncf %30 : vector<8x8xf32> to vector<8x8xbf16>
    %32 = vector.extract_strided_slice %2 {offsets = [0, 0], sizes = [8, 128], strides = [1, 1]} : vector<32x128xbf16> to vector<8x128xbf16>
    %cst_16 = arith.constant dense<0.000000e+00> : vector<8x128xf32>
    %33 = tpu.matmul %31, %32, %cst_16 {dimension_numbers = #tpu.dot_dimension_numbers<[1], [0], [0], [1], [0, 0, 1, 1], [], []>} : vector<8x8xbf16>, vector<8x128xbf16>, vector<8x128xf32> -> vector<8x128xf32>
    %34 = arith.addf %15, %33 : vector<8x128xf32>
    %35 = vector.extract_strided_slice %10 {offsets = [0, 8], sizes = [8, 8], strides = [1, 1]} : vector<8x128xf32> to vector<8x8xf32>
    %36 = vector.extract_strided_slice %13 {offsets = [0, 40], sizes = [16, 8], strides = [1, 1]} : vector<16x128xf32> to vector<16x8xf32>
    %37 = vector.extract_strided_slice %13 {offsets = [0, 72], sizes = [16, 8], strides = [1, 1]} : vector<16x128xf32> to vector<16x8xf32>
    %cst_17 = arith.constant dense<0.000000e+00> : vector<8x16xf32>
    %38 = tpu.matmul %35, %36, %cst_17 {dimension_numbers = #tpu.dot_dimension_numbers<[1], [1], [0], [0], [0, 0, 1, 0], [], []>} : vector<8x8xf32>, vector<16x8xf32>, vector<8x16xf32> -> vector<8x16xf32>
    %cst_18 = arith.constant dense<0xFF800000> : vector<8xf32>
    %39 = vector.multi_reduction <maximumf>, %38, %cst_18 [1] : vector<8x16xf32> to vector<8xf32>
    %40 = vector.shape_cast %39 : vector<8xf32> to vector<8x1xf32>
    %41 = vector.broadcast %40 : vector<8x1xf32> to vector<8x16xf32>
    %42 = arith.subf %38, %41 : vector<8x16xf32>
    %43 = math.exp %42 : vector<8x16xf32>
    %cst_19 = arith.constant dense<0.000000e+00> : vector<8xf32>
    %44 = vector.multi_reduction <add>, %43, %cst_19 [1] : vector<8x16xf32> to vector<8xf32>
    %45 = vector.shape_cast %44 : vector<8xf32> to vector<8x1xf32>
    %46 = tpu.reciprocal %45 {approx = true} : vector<8x1xf32> -> vector<8x1xf32>
    %47 = vector.broadcast %46 : vector<8x1xf32> to vector<8x16xf32>
    %48 = arith.mulf %43, %47 : vector<8x16xf32>
    %cst_20 = arith.constant dense<0.000000e+00> : vector<8x8xf32>
    %49 = tpu.matmul %48, %37, %cst_20 {dimension_numbers = #tpu.dot_dimension_numbers<[1], [0], [0], [1], [0, 0, 1, 1], [], []>} : vector<8x16xf32>, vector<16x8xf32>, vector<8x8xf32> -> vector<8x8xf32>
    %50 = arith.truncf %49 : vector<8x8xf32> to vector<8x8xbf16>
    %51 = vector.extract_strided_slice %2 {offsets = [8, 0], sizes = [8, 128], strides = [1, 1]} : vector<32x128xbf16> to vector<8x128xbf16>
    %cst_21 = arith.constant dense<0.000000e+00> : vector<8x128xf32>
    %52 = tpu.matmul %50, %51, %cst_21 {dimension_numbers = #tpu.dot_dimension_numbers<[1], [0], [0], [1], [0, 0, 1, 1], [], []>} : vector<8x8xbf16>, vector<8x128xbf16>, vector<8x128xf32> -> vector<8x128xf32>
    %53 = arith.addf %34, %52 : vector<8x128xf32>
    %54 = vector.extract_strided_slice %10 {offsets = [0, 16], sizes = [8, 8], strides = [1, 1]} : vector<8x128xf32> to vector<8x8xf32>
    %55 = vector.extract_strided_slice %13 {offsets = [0, 48], sizes = [16, 8], strides = [1, 1]} : vector<16x128xf32> to vector<16x8xf32>
    %56 = vector.extract_strided_slice %13 {offsets = [0, 80], sizes = [16, 8], strides = [1, 1]} : vector<16x128xf32> to vector<16x8xf32>
    %cst_22 = arith.constant dense<0.000000e+00> : vector<8x16xf32>
    %57 = tpu.matmul %54, %55, %cst_22 {dimension_numbers = #tpu.dot_dimension_numbers<[1], [1], [0], [0], [0, 0, 1, 0], [], []>} : vector<8x8xf32>, vector<16x8xf32>, vector<8x16xf32> -> vector<8x16xf32>
    %cst_23 = arith.constant dense<0xFF800000> : vector<8xf32>
    %58 = vector.multi_reduction <maximumf>, %57, %cst_23 [1] : vector<8x16xf32> to vector<8xf32>
    %59 = vector.shape_cast %58 : vector<8xf32> to vector<8x1xf32>
    %60 = vector.broadcast %59 : vector<8x1xf32> to vector<8x16xf32>
    %61 = arith.subf %57, %60 : vector<8x16xf32>
    %62 = math.exp %61 : vector<8x16xf32>
    %cst_24 = arith.constant dense<0.000000e+00> : vector<8xf32>
    %63 = vector.multi_reduction <add>, %62, %cst_24 [1] : vector<8x16xf32> to vector<8xf32>
    %64 = vector.shape_cast %63 : vector<8xf32> to vector<8x1xf32>
    %65 = tpu.reciprocal %64 {approx = true} : vector<8x1xf32> -> vector<8x1xf32>
    %66 = vector.broadcast %65 : vector<8x1xf32> to vector<8x16xf32>
    %67 = arith.mulf %62, %66 : vector<8x16xf32>
    %cst_25 = arith.constant dense<0.000000e+00> : vector<8x8xf32>
    %68 = tpu.matmul %67, %56, %cst_25 {dimension_numbers = #tpu.dot_dimension_numbers<[1], [0], [0], [1], [0, 0, 1, 1], [], []>} : vector<8x16xf32>, vector<16x8xf32>, vector<8x8xf32> -> vector<8x8xf32>
    %69 = arith.truncf %68 : vector<8x8xf32> to vector<8x8xbf16>
    %70 = vector.extract_strided_slice %2 {offsets = [16, 0], sizes = [8, 128], strides = [1, 1]} : vector<32x128xbf16> to vector<8x128xbf16>
    %cst_26 = arith.constant dense<0.000000e+00> : vector<8x128xf32>
    %71 = tpu.matmul %69, %70, %cst_26 {dimension_numbers = #tpu.dot_dimension_numbers<[1], [0], [0], [1], [0, 0, 1, 1], [], []>} : vector<8x8xbf16>, vector<8x128xbf16>, vector<8x128xf32> -> vector<8x128xf32>
    %72 = arith.addf %53, %71 : vector<8x128xf32>
    %73 = vector.extract_strided_slice %10 {offsets = [0, 24], sizes = [8, 8], strides = [1, 1]} : vector<8x128xf32> to vector<8x8xf32>
    %74 = vector.extract_strided_slice %13 {offsets = [0, 56], sizes = [16, 8], strides = [1, 1]} : vector<16x128xf32> to vector<16x8xf32>
    %75 = vector.extract_strided_slice %13 {offsets = [0, 88], sizes = [16, 8], strides = [1, 1]} : vector<16x128xf32> to vector<16x8xf32>
    %cst_27 = arith.constant dense<0.000000e+00> : vector<8x16xf32>
    %76 = tpu.matmul %73, %74, %cst_27 {dimension_numbers = #tpu.dot_dimension_numbers<[1], [1], [0], [0], [0, 0, 1, 0], [], []>} : vector<8x8xf32>, vector<16x8xf32>, vector<8x16xf32> -> vector<8x16xf32>
    %cst_28 = arith.constant dense<0xFF800000> : vector<8xf32>
    %77 = vector.multi_reduction <maximumf>, %76, %cst_28 [1] : vector<8x16xf32> to vector<8xf32>
    %78 = vector.shape_cast %77 : vector<8xf32> to vector<8x1xf32>
    %79 = vector.broadcast %78 : vector<8x1xf32> to vector<8x16xf32>
    %80 = arith.subf %76, %79 : vector<8x16xf32>
    %81 = math.exp %80 : vector<8x16xf32>
    %cst_29 = arith.constant dense<0.000000e+00> : vector<8xf32>
    %82 = vector.multi_reduction <add>, %81, %cst_29 [1] : vector<8x16xf32> to vector<8xf32>
    %83 = vector.shape_cast %82 : vector<8xf32> to vector<8x1xf32>
    %84 = tpu.reciprocal %83 {approx = true} : vector<8x1xf32> -> vector<8x1xf32>
    %85 = vector.broadcast %84 : vector<8x1xf32> to vector<8x16xf32>
    %86 = arith.mulf %81, %85 : vector<8x16xf32>
    %cst_30 = arith.constant dense<0.000000e+00> : vector<8x8xf32>
    %87 = tpu.matmul %86, %75, %cst_30 {dimension_numbers = #tpu.dot_dimension_numbers<[1], [0], [0], [1], [0, 0, 1, 1], [], []>} : vector<8x16xf32>, vector<16x8xf32>, vector<8x8xf32> -> vector<8x8xf32>
    %88 = arith.truncf %87 : vector<8x8xf32> to vector<8x8xbf16>
    %89 = vector.extract_strided_slice %2 {offsets = [24, 0], sizes = [8, 128], strides = [1, 1]} : vector<32x128xbf16> to vector<8x128xbf16>
    %cst_31 = arith.constant dense<0.000000e+00> : vector<8x128xf32>
    %90 = tpu.matmul %88, %89, %cst_31 {dimension_numbers = #tpu.dot_dimension_numbers<[1], [0], [0], [1], [0, 0, 1, 1], [], []>} : vector<8x8xbf16>, vector<8x128xbf16>, vector<8x128xf32> -> vector<8x128xf32>
    %91 = arith.addf %72, %90 : vector<8x128xf32>
    %c0_32 = arith.constant 0 : index
    %c0_33 = arith.constant 0 : index
    %92 = vector.load %arg7[%c0_32, %c0_33] : memref<8x128xf32, #tpu.memory_space<vmem>>, vector<8x128xf32>
    tpu.vector_store %arg7[%c0_32, %c0_33], %91 {strides = array<i32>} : memref<8x128xf32, #tpu.memory_space<vmem>>, vector<8x128xf32>,
    return
  }
  func.func @transform_0(%arg0: i32) -> (i32, i32) {
    %c0_i32 = arith.constant 0 : i32
    %c0_i32_0 = arith.constant 0 : i32
    return %arg0, %c0_i32 : i32, i32
  }
  func.func @transform_1(%arg0: i32) -> (i32, i32) {
    %c0_i32 = arith.constant 0 : i32
    %c0_i32_0 = arith.constant 0 : i32
    return %arg0, %c0_i32 : i32, i32
  }
  func.func @transform_2(%arg0: i32) -> (i32, i32) {
    %c0_i32 = arith.constant 0 : i32
    %c0_i32_0 = arith.constant 0 : i32
    %c0_i32_1 = arith.constant 0 : i32
    return %c0_i32, %c0_i32_0 : i32, i32
  }
  func.func @transform_3(%arg0: i32) -> (i32, i32) {
    %c0_i32 = arith.constant 0 : i32
    %c0_i32_0 = arith.constant 0 : i32
    %c0_i32_1 = arith.constant 0 : i32
    return %c0_i32, %c0_i32_0 : i32, i32
  }
  func.func @transform_4(%arg0: i32) -> (i32, i32) {
    %c0_i32 = arith.constant 0 : i32
    %c0_i32_0 = arith.constant 0 : i32
    %c0_i32_1 = arith.constant 0 : i32
    return %c0_i32, %c0_i32_0 : i32, i32
  }
  func.func @transform_5(%arg0: i32) -> (i32, i32) {
    %c0_i32 = arith.constant 0 : i32
    %c0_i32_0 = arith.constant 0 : i32
    %c0_i32_1 = arith.constant 0 : i32
    return %c0_i32, %c0_i32_0 : i32, i32
  }
  func.func @transform_6(%arg0: i32) -> (i32, i32) {
    %c0_i32 = arith.constant 0 : i32
    %c0_i32_0 = arith.constant 0 : i32
    return %arg0, %c0_i32 : i32, i32
  }
}

</mosaic_0001>

<bundles_post_ra>
// kernel: mh_item_attention_batched.1
= control target key start
LH: loop header
LB: loop body
LE: loop exit
PB: predicated region body
PF: predicated region fallthrough
CT: control target
= control target key end

     0   :  { %11 = vsyncpa [#allocation3], 0  ;;  %s1574_s0 = inlined_call_operand.hbm [shape: f32[8,32], index: 0, kind: input, shape index: {}]   ;;  %s1575_s1 = inlined_call_operand.hbm [shape: f32[16,32], index: 1, kind: input, shape index: {}]   ;;  %s1576_s2 = inlined_call_operand.hbm [shape: bf16[32,128], index: 2, kind: input, shape index: {}]   ;;  %s1577_s3 = inlined_call_operand.vmem [shape: f32[1,128], index: 3, kind: input, shape index: {}]   ;;  %s1578_s4 = inlined_call_operand.hbm [shape: bf16[32,128], index: 4, kind: input, shape index: {}]   ;;  %s1579_s5 = inlined_call_operand.vmem [shape: f32[1,128], index: 5, kind: input, shape index: {}]   ;;  %s1580_s6 = inlined_call_operand.vmem [shape: f32[8,128], index: 6, kind: output, shape index: {}]  }
   0x1   :  { %12 = vsyncpa [#allocation5], 0 }
   0x2   :  { %13 = vsyncpa [#allocation8], 0  ;;  %s1380_s21 = smov [#allocation4]  }
   0x3   :  { %s29_s22 = sshll.u32 %s1380_s21, 4  ;;  %s30_s22 = int_to_ptr.vmem [resolvable:$true] %s29_s22 }
   0x4   :  { %s1302_s23 = scalar_lea.vmem %s30_s22, 256  ;;  %p1307_p1 = scmp.lt.s32.totalorder %s30_s22, %s30_s22 }
   0x5   :  { %p1303_p0 = scmp.ne.s32.totalorder %s30_s22, %s1302_s23  ;;  %p1308_p2 = scmp.lt.s32.totalorder %s1302_s23, %s1302_s23 }
   0x7   :  { %p1309_p3 = por %p1308_p2, %p1307_p1 }
   0x9   :  { %p1310_p4 = pnand %p1309_p3, %p1303_p0 }
   0xb   :  { %1313 = shalt.err (!%p1310_p4)
}
   0xc   :  { %s1381_s24 = smov 128   ;;  %s1382_s25 = smov 8  }
   0xd   :  { %35 = dma.hbm_to_vmem [thread:$0]  %s1575_s1, 256, %s30_s22, [#allocation5], %s1381_s24, %s1381_s24, %s1382_s25  }
   0xe   :  { %s1383_s28 = smov [#allocation2]   ;;  %s1384_s30 = smov [#allocation6]  }
   0xf   :  { %s20_s29 = sshll.u32 %s1383_s28, 4  ;;  %s41_s7 = sshll.u32 %s1384_s30, 4  ;;  %s21_s29 = int_to_ptr.vmem [resolvable:$true] %s20_s29  ;;  %s42_s7 = int_to_ptr.vmem [resolvable:$true] %s41_s7 }
  0x10   :  { %s1322_s8 = scalar_lea.vmem %s21_s29, 128  ;;  %p1327_p6 = scmp.lt.s32.totalorder %s21_s29, %s21_s29 }
  0x11   :  { %p1323_p5 = scmp.ne.s32.totalorder %s21_s29, %s1322_s8  ;;  %p1328_p7 = scmp.lt.s32.totalorder %s1322_s8, %s1322_s8 }
  0x13   :  { %p1329_p8 = por %p1328_p7, %p1327_p6 }
  0x15   :  { %p1330_p9 = pnand %p1329_p8, %p1323_p5 }
  0x17   :  { %1333 = shalt.err (!%p1330_p9)
}
  0x18   :  { %23 = dma.hbm_to_vmem [thread:$0]  %s1574_s0, 128, %s21_s29, [#allocation3]  }
  0x19   :  { %s1342_s11 = scalar_lea.vmem %s42_s7, 256  ;;  %p1347_p11 = scmp.lt.s32.totalorder %s42_s7, %s42_s7 }
  0x1a   :  { %p1343_p10 = scmp.ne.s32.totalorder %s42_s7, %s1342_s11  ;;  %p1348_p12 = scmp.lt.s32.totalorder %s1342_s11, %s1342_s11 }
  0x1c   :  { %p1349_p13 = por %p1348_p12, %p1347_p11 }
  0x1e   :  { %p1350_p0 = pnand %p1349_p13, %p1343_p10 }
  0x20   :  { %1353 = shalt.err (!%p1350_p0)
}
  0x21   :  { %s1385_s1 = smov 64   ;;  %s1386_s12 = smov 4  }
  0x22   :  { %47 = dma.hbm_to_vmem [thread:$0]  %s1576_s2, 256, %s42_s7, [#allocation5], %s1385_s1, %s1385_s1, %s1386_s12  }
  0x23   :  { %s1387_s15 = smov [#allocation7]  }
  0x24   :  { %s55_s16 = sshll.u32 %s1387_s15, 4  ;;  %s56_s16 = int_to_ptr.vmem [resolvable:$true] %s55_s16 }
  0x25   :  { %s1362_s0 = scalar_lea.vmem %s56_s16, 256  ;;  %p1367_p2 = scmp.lt.s32.totalorder %s56_s16, %s56_s16 }
  0x26   :  { %p1363_p1 = scmp.ne.s32.totalorder %s56_s16, %s1362_s0  ;;  %p1368_p3 = scmp.lt.s32.totalorder %s1362_s0, %s1362_s0 }
  0x28   :  { %p1369_p4 = por %p1368_p3, %p1367_p2 }
  0x2a   :  { %p1370_p5 = pnand %p1369_p4, %p1363_p1 }
  0x2c   :  { %1373 = shalt.err (!%p1370_p5)
}
  0x2d   :  { %61 = dma.hbm_to_vmem [thread:$0]  %s1578_s4, 256, %s56_s16, [#allocation8], %s1385_s1, %s1385_s1, %s1386_s12  }
  0x2e   :  { %1374 = dma.done.wait [#allocation3], 128  }
  0x2f   :  { %1375 = vsyncadd [#allocation3], 4294967168 }
  0x30   :  { %1376 = dma.done.wait [#allocation5], 512  }
  0x31   :  { %1377 = vsyncadd [#allocation5], 4294966784 }
  0x32   :  { %1378 = dma.done.wait [#allocation8], 256  }
  0x33   :  { %1379 = vsyncadd [#allocation8], 4294967040  ;;  %v1388_v0 = vmov 0.0   ;;  %vm1389_vm0 = vmmov 0   ;;  %v1276_v1 = vld [vmem:[#allocation6 + $0x8] sm:$0xff]   ;;  %v1277_v2 = vld [vmem:[#allocation6] sm:$0xff]  }
  0x34   :  { %1168 = vmatprep.subr.bf16.mxu1 %v1388_v0  ;;  %1172 = vmatprep.mubr.msk.bf16.mxu1 %vm1389_vm0, %v1388_v0  ;;  %v89_v3 = vld [vmem:[#allocation4] sm:$0xff]  ;;  %v90_v4 = vld [vmem:[#allocation4 + $0x8] sm:$0xff]  ;;  %v87_v5 = vld [vmem:[#allocation2] sm:$0xff]  ;;  %vm110_vm1 = vcmask 261120   ;;  %s1390_s19 = smov 96   ;;  %s1391_s20 = smov 88  }
  0x35   :  { %1160 = vmatprep.subr.bf16.mxu0 %v1388_v0  ;;  %1164 = vmatprep.mubr.msk.bf16.mxu0 %vm1389_vm0, %v1388_v0  ;;  %v91_v6 = vpack.c.bf16 %v90_v4, %v89_v3  ;;  %v88_v7 = vpack.c.bf16 %v87_v5, %v87_v5  ;;  %v1096_v12 = vld [vmem:[%s1577_s3] ss:$0 sm:$0xff]  ;;  %s1392_s3 = smov 120   ;;  %vm210_vm2 = vcmask 64512   ;;  %vm288_vm3 = vcmask 130048   ;;  %s1393_s21 = smov 56  }
  0x36   :  { %1169 = vmatpush3.bf16.msra.mxu1 %v1276_v1  ;;  %1161 = vmatpush3.bf16.msra.mxu0 %v1276_v1  ;;  %v82_v38 = vld [vmem:[#allocation7] sm:$0xf]  ;;  %vm383_vm4 = vcmask 1043456   ;;  %s1394_s22 = smov 80   ;;  %s1395_s23 = smov 112  }
  0x37   :  { %1170 = vmatprep.subr.bf16.mxu1 %v1388_v0  ;;  %1162 = vmatprep.subr.bf16.mxu0 %v1388_v0  ;;  %v385_v39 = vsel %vm383_vm4, %v82_v38, 0  ;;  %v83_v63 = vld [vmem:[#allocation7 + $0x4] sm:$0xf]  ;;  %s1396_s24 = smov 48   ;;  %s1397_s25 = smov 72  }
  0x38   :  { %v605_v1 = vsel %vm383_vm4, %v83_v63, 0  ;;  %s1398_s26 = smov 104  }
  0x3a   :  { %1171 = vmatpush3.bf16.msra.mxu1 %v1277_v2  ;;  %1163 = vmatpush3.bf16.msra.mxu0 %v1277_v2 }
  0x3b   :  { %1176 = vmatprep.subr.mxu0 %v1388_v0  ;;  %1183 = vmatprep.subr.mxu1 %v1388_v0 }
  0x3d   :  { %1173 = vmatmul.mubr.msk.bf16.vlgmr.msra.gmra.mxu1 %vm110_vm1, %v91_v6  ;;  %1165 = vmatmul.mubr.msk.bf16.vlgmr.msra.gmra.mxu0 %vm110_vm1, %v88_v7 }
  0x3e   :  { %1180 = vmatprep.mubr.msk.f32.mxu0 %vm1389_vm0, %v1388_v0  ;;  %1187 = vmatprep.mubr.msk.f32.mxu1 %vm1389_vm0, %v1388_v0 }
  0xfd   :  { %v191_v8 = vpop.f32.mrf.mxu1  ;;  %v148_v9 = vpop.f32.mrf.mxu0 }
  0xfe   :  { %v1471_v18 = vadd.f32 %v1096_v12, %v191_v8  ;;  %v1478_v19 = vadd.f32 %v1096_v12, %v148_v9 }
  0xff   :  { %v1174_v10 = vpop.f32.mrf.mxu1  ;;  %v1166_v11 = vpop.f32.mrf.mxu0 }
 0x101   :  { %v194_v13 = vpop.f32.mrf.mxu1  ;;  %v151_v14 = vpop.f32.mrf.mxu0 }
 0x102   :  { %v1468_v15 = vadd.f32 %v1096_v12, %v194_v13  ;;  %v1101_v13 = vld [vmem:[%s1579_s5] ss:$0 sm:$0xff]  ;;  %s1399_s5 = smov 40  }
 0x103   :  { %v1175_v16 = vpop.f32.mrf.mxu1  ;;  %v1167_v17 = vpop.f32.mrf.mxu0 }
 0x104   :  { %208 = vrot.lane.b32.xlu0 %v1468_v15, %s1390_s19 }
 0x108   :  { %206 = vrot.lane.b32.xlu0 %v1471_v18, %s1390_s19 }
 0x10c   :  { %302 = vrot.lane.b32.xlu0 %v1468_v15, %s1385_s1 }
 0x110   :  { %432 = vrot.lane.b32.xlu0 %v1468_v15, %s1391_s20 }
 0x114   :  { %430 = vrot.lane.b32.xlu0 %v1471_v18, %s1391_s20 }
 0x118   :  { %428 = vrot.lane.b32.xlu0 %v1478_v19, %s1392_s3 }
 0x176   :  { %v209_v20 = vpop.permute.xlu0 %208 }
 0x177   :  { %1177 = vmatpush3.xpose.msk.msra.mxu0 %vm210_vm2, %v209_v20 }
 0x178   :  { %1178 = vmatprep.subr.mxu0 %v1388_v0 }
 0x17a   :  { %v207_v21 = vpop.permute.xlu0 %206 }
 0x17b   :  { %1179 = vmatpush3.xpose.msk.msra.mxu0 %vm210_vm2, %v207_v21 }
 0x17c   :  { %1190 = vmatprep.subr.bf16.mxu0 %v1388_v0 }
 0x17e   :  { %v303_v22 = vpop.permute.xlu0 %302  ;;  %1181 = vmatmul.mubr.msk.f32.vlgmr.msra.gmra.mxu0 %vm210_vm2, %v1478_v19 }
 0x17f   :  { %1184 = vmatpush3.msra.mxu1 %v303_v22  ;;  %1192 = vmatprep.mubr.msk.bf16.mxu0 %vm1389_vm0, %v1388_v0 }
 0x180   :  { %1185 = vmatprep.subr.mxu1 %v1388_v0  ;;  %1191 = vmatpush3.bf16.msra.mxu0 %v385_v39 }
 0x181   :  { %1203 = vmatprep.subr.mxu0 %v1388_v0 }
 0x182   :  { %v433_v34 = vpop.permute.xlu0 %432 }
 0x186   :  { %v431_v36 = vpop.permute.xlu0 %430 }
 0x18a   :  { %v429_v37 = vpop.permute.xlu0 %428 }
 0x23e   :  { %v284_v23 = vpop.f32.mrf.mxu0 }
 0x23f   :  { %v289_v24 = vsel %vm288_vm3, %v284_v23, -inf }
 0x240   :  { %290 = vmax.xlane.f32.xlu1 %v289_v24  ;;  %v1182_v25 = vpop.f32.mrf.mxu0 }
 0x2c9   :  { %v291_v26 = vpop.xlane.xlu1 %290 }
 0x2ca   :  { %v292_v27 = vsub.f32 %v284_v23, %v291_v26 }
 0x2cc   :  { %v293_v28 = vmul.f32 1.442695, %v292_v27 }
 0x2ce   :  { %1278 = vpow2.f32 %v293_v28 }
 0x2db   :  { %v1279_v29 = vpop.eup %1278 }
 0x2dc   :  { %v295_v30 = vsel %vm288_vm3, %v1279_v29, 0.0 }
 0x2dd   :  { %296 = vadd.xlane.f32.xlu1 %v295_v30  ;;  %v84_v30 = vld [vmem:[#allocation7 + $0x8] sm:$0xf] }
 0x2ee   :  { %300 = vrot.lane.b32.xlu1 %v1471_v18, %s1385_s1 }
 0x2f2   :  { %521 = vrot.lane.b32.xlu1 %v1471_v18, %s1393_s21 }
 0x366   :  { %v297_v31 = vpop.xlane.xlu1 %296 }
 0x367   :  { %1280 = vrcp.f32 %v297_v31  ;;  %v825_v31 = vsel %vm383_vm4, %v84_v30, 0 }
 0x36a   :  { %v301_v32 = vpop.permute.xlu1 %300 }
 0x36b   :  { %1186 = vmatpush3.msra.mxu1 %v301_v32 }
 0x36c   :  { %1196 = vmatprep.subr.mxu1 %v1388_v0 }
 0x36e   :  { %v522_v50 = vpop.permute.xlu1 %521 }
 0x374   :  { %v1281_v33 = vpop.eup %1280 }
 0x375   :  { %v299_v35 = vmul.f32 %v1281_v33, %v1279_v29 }
 0x377   :  { %1188 = vmatmul.mubr.msk.f32.vlgmr.msra.gmra.mxu1 %vm288_vm3, %v299_v35 }
 0x378   :  { %1197 = vmatpush3.xpose.msk.msra.mxu1 %vm210_vm2, %v433_v34  ;;  %1200 = vmatprep.mubr.msk.f32.mxu1 %vm1389_vm0, %v1388_v0 }
 0x379   :  { %1198 = vmatprep.subr.mxu1 %v1388_v0 }
 0x37c   :  { %1199 = vmatpush3.xpose.msk.msra.mxu1 %vm210_vm2, %v431_v36 }
 0x37d   :  { %1210 = vmatprep.subr.bf16.mxu1 %v1388_v0 }
 0x37f   :  { %1201 = vmatmul.mubr.msk.f32.vlgmr.msra.gmra.mxu1 %vm210_vm2, %v429_v37 }
 0x380   :  { %1212 = vmatprep.mubr.msk.bf16.mxu1 %vm1389_vm0, %v1388_v0  ;;  %1211 = vmatpush3.bf16.msra.mxu1 %v605_v1 }
 0x381   :  { %1223 = vmatprep.subr.mxu1 %v1388_v0 }
 0x437   :  { %v375_v40 = vpop.f32.mrf.mxu1 }
 0x438   :  { %v379_v41 = vpack.c.bf16 %v375_v40, %v375_v40 }
 0x439   :  { %v1189_v42 = vpop.f32.mrf.mxu1 }
 0x43a   :  { %1193 = vmatmul.mubr.msk.bf16.vlgmr.msra.gmra.mxu0 %vm210_vm2, %v379_v41 }
 0x43b   :  { %1207 = vmatprep.mubr.msk.f32.mxu0 %vm1389_vm0, %v1388_v0 }
 0x43f   :  { %v506_v43 = vpop.f32.mrf.mxu1 }
 0x440   :  { %v510_v44 = vsel %vm288_vm3, %v506_v43, -inf }
 0x441   :  { %511 = vmax.xlane.f32.xlu0 %v510_v44  ;;  %v1202_v45 = vpop.f32.mrf.mxu1 }
 0x457   :  { %523 = vrot.lane.b32.xlu0 %v1468_v15, %s1393_s21 }
 0x45b   :  { %652 = vrot.lane.b32.xlu0 %v1468_v15, %s1394_s22 }
 0x45f   :  { %648 = vrot.lane.b32.xlu0 %v1478_v19, %s1395_s23 }
 0x4ca   :  { %v512_v46 = vpop.xlane.xlu0 %511 }
 0x4cb   :  { %v513_v47 = vsub.f32 %v506_v43, %v512_v46 }
 0x4cd   :  { %v514_v48 = vmul.f32 1.442695, %v513_v47 }
 0x4ce   :  { %v524_v49 = vpop.permute.xlu0 %523 }
 0x4cf   :  { %1282 = vpow2.f32 %v514_v48  ;;  %1204 = vmatpush3.msra.mxu0 %v524_v49 }
 0x4d0   :  { %1205 = vmatprep.subr.mxu0 %v1388_v0 }
 0x4d1   :  { %1206 = vmatpush3.msra.mxu0 %v522_v50 }
 0x4d2   :  { %1216 = vmatprep.subr.mxu0 %v1388_v0  ;;  %v653_v60 = vpop.permute.xlu0 %652 }
 0x4d6   :  { %v649_v62 = vpop.permute.xlu0 %648 }
 0x4dc   :  { %v1283_v51 = vpop.eup %1282 }
 0x4dd   :  { %v516_v52 = vsel %vm288_vm3, %v1283_v51, 0.0 }
 0x4de   :  { %517 = vadd.xlane.f32.xlu1 %v516_v52 }
 0x4ef   :  { %650 = vrot.lane.b32.xlu1 %v1471_v18, %s1394_s22 }
 0x4fa   :  { %v421_v53 = vpop.f32.mrf.mxu0 }
 0x4fb   :  { %v427_v14 = vadd.f32 %v1101_v13, %v421_v53 }
 0x4fc   :  { %v1194_v54 = vpop.f32.mrf.mxu0 }
 0x4fe   :  { %v424_v55 = vpop.f32.mrf.mxu0 }
 0x500   :  { %v1195_v56 = vpop.f32.mrf.mxu0 }
 0x567   :  { %v518_v57 = vpop.xlane.xlu1 %517 }
 0x568   :  { %1284 = vrcp.f32 %v518_v57 }
 0x56b   :  { %v651_v61 = vpop.permute.xlu1 %650 }
 0x575   :  { %v1285_v58 = vpop.eup %1284 }
 0x576   :  { %v520_v59 = vmul.f32 %v1285_v58, %v1283_v51 }
 0x578   :  { %1208 = vmatmul.mubr.msk.f32.vlgmr.msra.gmra.mxu0 %vm288_vm3, %v520_v59 }
 0x579   :  { %1217 = vmatpush3.xpose.msk.msra.mxu0 %vm210_vm2, %v653_v60  ;;  %1220 = vmatprep.mubr.msk.f32.mxu0 %vm1389_vm0, %v1388_v0 }
 0x57a   :  { %1218 = vmatprep.subr.mxu0 %v1388_v0 }
 0x57d   :  { %1219 = vmatpush3.xpose.msk.msra.mxu0 %vm210_vm2, %v651_v61 }
 0x57e   :  { %1230 = vmatprep.subr.bf16.mxu0 %v1388_v0 }
 0x580   :  { %1221 = vmatmul.mubr.msk.f32.vlgmr.msra.gmra.mxu0 %vm210_vm2, %v649_v62 }
 0x581   :  { %1232 = vmatprep.mubr.msk.bf16.mxu0 %vm1389_vm0, %v1388_v0  ;;  %1231 = vmatpush3.bf16.msra.mxu0 %v825_v31 }
 0x582   :  { %1243 = vmatprep.subr.mxu0 %v1388_v0 }
 0x638   :  { %v596_v2 = vpop.f32.mrf.mxu0 }
 0x639   :  { %v600_v3 = vpack.c.bf16 %v596_v2, %v596_v2 }
 0x63a   :  { %v1209_v4 = vpop.f32.mrf.mxu0 }
 0x63b   :  { %1213 = vmatmul.mubr.msk.bf16.vlgmr.msra.gmra.mxu1 %vm210_vm2, %v600_v3 }
 0x63c   :  { %1227 = vmatprep.mubr.msk.f32.mxu1 %vm1389_vm0, %v1388_v0 }
 0x640   :  { %v726_v5 = vpop.f32.mrf.mxu0 }
 0x641   :  { %v730_v6 = vsel %vm288_vm3, %v726_v5, -inf }
 0x642   :  { %731 = vmax.xlane.f32.xlu1 %v730_v6  ;;  %v1222_v7 = vpop.f32.mrf.mxu0 }
 0x653   :  { %741 = vrot.lane.b32.xlu1 %v1471_v18, %s1396_s24 }
 0x657   :  { %872 = vrot.lane.b32.xlu1 %v1468_v15, %s1397_s25 }
 0x65b   :  { %868 = vrot.lane.b32.xlu1 %v1478_v19, %s1398_s26 }
 0x6cb   :  { %v732_v8 = vpop.xlane.xlu1 %731 }
 0x6cc   :  { %v733_v9 = vsub.f32 %v726_v5, %v732_v8 }
 0x6ce   :  { %v734_v10 = vmul.f32 1.442695, %v733_v9 }
 0x6cf   :  { %v742_v24 = vpop.permute.xlu1 %741 }
 0x6d0   :  { %1286 = vpow2.f32 %v734_v10 }
 0x6d3   :  { %v873_v27 = vpop.permute.xlu1 %872 }
 0x6d7   :  { %v869_v29 = vpop.permute.xlu1 %868 }
 0x6dd   :  { %v1287_v11 = vpop.eup %1286 }
 0x6de   :  { %v736_v12 = vsel %vm288_vm3, %v1287_v11, 0.0 }
 0x6df   :  { %737 = vadd.xlane.f32.xlu0 %v736_v12 }
 0x6f5   :  { %743 = vrot.lane.b32.xlu0 %v1468_v15, %s1396_s24 }
 0x6f9   :  { %870 = vrot.lane.b32.xlu0 %v1471_v18, %s1397_s25 }
 0x6fb   :  { %v641_v16 = vpop.f32.mrf.mxu1 }
 0x6fc   :  { %v647_v17 = vadd.f32 %v641_v16, %v427_v14 }
 0x6fd   :  { %v1214_v19 = vpop.f32.mrf.mxu1 }
 0x6ff   :  { %v644_v20 = vpop.f32.mrf.mxu1 }
 0x701   :  { %v1215_v21 = vpop.f32.mrf.mxu1 }
 0x768   :  { %v738_v22 = vpop.xlane.xlu0 %737 }
 0x769   :  { %1288 = vrcp.f32 %v738_v22 }
 0x76c   :  { %v744_v23 = vpop.permute.xlu0 %743 }
 0x76d   :  { %1224 = vmatpush3.msra.mxu1 %v744_v23 }
 0x76e   :  { %1225 = vmatprep.subr.mxu1 %v1388_v0 }
 0x76f   :  { %1226 = vmatpush3.msra.mxu1 %v742_v24 }
 0x770   :  { %1236 = vmatprep.subr.mxu1 %v1388_v0  ;;  %v871_v28 = vpop.permute.xlu0 %870 }
 0x776   :  { %v1289_v25 = vpop.eup %1288 }
 0x777   :  { %v740_v26 = vmul.f32 %v1289_v25, %v1287_v11 }
 0x779   :  { %1228 = vmatmul.mubr.msk.f32.vlgmr.msra.gmra.mxu1 %vm288_vm3, %v740_v26 }
 0x77a   :  { %1237 = vmatpush3.xpose.msk.msra.mxu1 %vm210_vm2, %v873_v27  ;;  %1240 = vmatprep.mubr.msk.f32.mxu1 %vm1389_vm0, %v1388_v0 }
 0x77b   :  { %1238 = vmatprep.subr.mxu1 %v1388_v0 }
 0x77e   :  { %1239 = vmatpush3.xpose.msk.msra.mxu1 %vm210_vm2, %v871_v28 }
 0x77f   :  { %1250 = vmatprep.subr.bf16.mxu1 %v1388_v0 }
 0x781   :  { %1241 = vmatmul.mubr.msk.f32.vlgmr.msra.gmra.mxu1 %vm210_vm2, %v869_v29 }
 0x782   :  { %1252 = vmatprep.mubr.msk.bf16.mxu1 %vm1389_vm0, %v1388_v0 }
 0x839   :  { %v816_v32 = vpop.f32.mrf.mxu1 }
 0x83a   :  { %v820_v33 = vpack.c.bf16 %v816_v32, %v816_v32 }
 0x83b   :  { %v1229_v34 = vpop.f32.mrf.mxu1 }
 0x83c   :  { %1233 = vmatmul.mubr.msk.bf16.vlgmr.msra.gmra.mxu0 %vm210_vm2, %v820_v33 }
 0x83d   :  { %1247 = vmatprep.mubr.msk.f32.mxu0 %vm1389_vm0, %v1388_v0 }
 0x841   :  { %v946_v35 = vpop.f32.mrf.mxu1 }
 0x842   :  { %v950_v36 = vsel %vm288_vm3, %v946_v35, -inf }
 0x843   :  { %951 = vmax.xlane.f32.xlu0 %v950_v36  ;;  %v1242_v37 = vpop.f32.mrf.mxu1 }
 0x859   :  { %963 = vrot.lane.b32.xlu0 %v1468_v15, %s1399_s5 }
 0x8cc   :  { %v952_v38 = vpop.xlane.xlu0 %951 }
 0x8cd   :  { %v953_v39 = vsub.f32 %v946_v35, %v952_v38 }
 0x8cf   :  { %v954_v40 = vmul.f32 1.442695, %v953_v39 }
 0x8d0   :  { %v964_v41 = vpop.permute.xlu0 %963 }
 0x8d1   :  { %1290 = vpow2.f32 %v954_v40  ;;  %1244 = vmatpush3.msra.mxu0 %v964_v41 }
 0x8d2   :  { %1245 = vmatprep.subr.mxu0 %v1388_v0  ;;  %v85_v0 = vld [vmem:[#allocation7 + $0xc] sm:$0xf] }
 0x8d3   :  { %v1045_v52 = vsel %vm383_vm4, %v85_v0, 0 }
 0x8d4   :  { %1251 = vmatpush3.bf16.msra.mxu1 %v1045_v52 }
 0x8de   :  { %v1291_v42 = vpop.eup %1290 }
 0x8df   :  { %v956_v43 = vsel %vm288_vm3, %v1291_v42, 0.0 }
 0x8e0   :  { %957 = vadd.xlane.f32.xlu1 %v956_v43 }
 0x8f1   :  { %961 = vrot.lane.b32.xlu1 %v1471_v18, %s1399_s5 }
 0x8fc   :  { %v861_v44 = vpop.f32.mrf.mxu0 }
 0x8fd   :  { %v867_v45 = vadd.f32 %v861_v44, %v647_v17 }
 0x8fe   :  { %v1234_v46 = vpop.f32.mrf.mxu0 }
 0x900   :  { %v864_v47 = vpop.f32.mrf.mxu0 }
 0x902   :  { %v1235_v48 = vpop.f32.mrf.mxu0 }
 0x969   :  { %v958_v15 = vpop.xlane.xlu1 %957 }
 0x96a   :  { %1292 = vrcp.f32 %v958_v15 }
 0x96d   :  { %v962_v49 = vpop.permute.xlu1 %961 }
 0x96e   :  { %1246 = vmatpush3.msra.mxu0 %v962_v49 }
 0x977   :  { %v1293_v50 = vpop.eup %1292 }
 0x978   :  { %v960_v51 = vmul.f32 %v1293_v50, %v1291_v42 }
 0x97a   :  { %1248 = vmatmul.mubr.msk.f32.vlgmr.msra.gmra.mxu0 %vm288_vm3, %v960_v51 }
 0xa3a   :  { %v1036_v53 = vpop.f32.mrf.mxu0 }
 0xa3b   :  { %v1040_v54 = vpack.c.bf16 %v1036_v53, %v1036_v53 }
 0xa3c   :  { %v1249_v18 = vpop.f32.mrf.mxu0 }
 0xa3d   :  { %1253 = vmatmul.mubr.msk.bf16.vlgmr.msra.gmra.mxu1 %vm210_vm2, %v1040_v54 }
 0xafd   :  { %v1081_v55 = vpop.f32.mrf.mxu1 }
 0xafe   :  { %v1087_v56 = vadd.f32 %v1081_v55, %v867_v45 }
 0xaff   :  { %v1254_v57 = vpop.f32.mrf.mxu1 }
 0xb00   :  { %1088 = vst [vmem:[%s1580_s6] sm:$0xff] %v1087_v56 }
 0xb01   :  { %v1084_v58 = vpop.f32.mrf.mxu1 }
 0xb03   :  { %v1255_v59 = vpop.f32.mrf.mxu1 }
 0xb04   :  { %1093 = vsyncpa [#allocation3], 1 }
 0xb05   :  { %1094 = vsyncpa [#allocation5], 1 }
 0xb06   :  { %1095 = vsyncpa [#allocation8], 1 }

</bundles_post_ra>
